<compile_context>
chip_gen: v5e
topology: v5e:2x2
jax: 0.10.0
libtpu: 0.0.40
codegen_flags: <defaults>
</compile_context>

<pallas_src>
import functools

import numpy as np
import jax
import jax.numpy as jnp
from jax import lax
from jax.experimental import pallas as pl
from jax.experimental.pallas import tpu as pltpu


# ---------------------------------------------------------------------------
# Kernel: linear + power-normalization, one (row-tile) block per grid step
# ---------------------------------------------------------------------------
def _normalizer_kernel(x_ref, w_ref, b_ref, o_ref, *, power):
    # x_ref: (tile_m, K)   w_ref: (K, N)   b_ref: (1, N)   o_ref: (tile_m, N)
    z = jnp.dot(x_ref[...], w_ref[...], preferred_element_type=jnp.float32)
    z = z + b_ref[...]                                   # bias broadcast on lanes

    if power == 2:
        # sum of squares -> rsqrt on the EUP (free slot), then multiply.
        inv_norm = lax.rsqrt(jnp.sum(z * z, axis=-1, keepdims=True))
    else:
        # ||z||_p^{-1} = (sum z^p)^{-1/p}: one transcendental per row (EUP).
        s = jnp.sum(jnp.power(z, power), axis=-1, keepdims=True)
        inv_norm = jnp.power(s, -1.0 / power)

    o_ref[...] = (z * inv_norm).astype(o_ref.dtype)


def _round_up(v, m):
    return (v + m - 1) // m * m


# ---------------------------------------------------------------------------
# Wrapper
# ---------------------------------------------------------------------------
def normalizer4crd_forward(params, x, *, power=2, block_m=256):
    """x: (M, K) float32 -> (M, N) float32 with N = out_features."""
    w, b = params["w"], params["b"]                       # (K, N), (1, N)
    M, K = x.shape
    N = w.shape[1]

    # Lane-dense output: pad N to a multiple of 128.  Padded weight/bias
    # columns are zero, so the padded z columns are exactly 0 and contribute
    # nothing to the p-norm (0**p == 0 for p > 0) -> numerically exact.
    n_pad = _round_up(N, 128)
    if n_pad != N:
        w = jnp.pad(w, ((0, 0), (0, n_pad - N)))
        b = jnp.pad(b, ((0, 0), (0, n_pad - N)))

    # Row tile: multiple of 8 (sublane), capped by block_m; pad rows if needed.
    tile_m = min(block_m, _round_up(M, 8))
    m_pad = _round_up(M, tile_m)
    if m_pad != M:
        x = jnp.pad(x, ((0, m_pad - M), (0, 0)))          # padded rows sliced off

    kern = functools.partial(_normalizer_kernel, power=power)
    out = pl.pallas_call(
        kern,
        out_shape=jax.ShapeDtypeStruct((m_pad, n_pad), x.dtype),
        grid=(m_pad // tile_m,),
        in_specs=[
            pl.BlockSpec((tile_m, K), lambda i: (i, 0)),   # row tile of x
            pl.BlockSpec((K, n_pad), lambda i: (0, 0)),    # full weight (VMEM-resident)
            pl.BlockSpec((1, n_pad), lambda i: (0, 0)),    # bias (VMEM-resident)
        ],
        out_specs=pl.BlockSpec((tile_m, n_pad), lambda i: (i, 0)),
        compiler_params=pltpu.CompilerParams(
            dimension_semantics=("parallel",)),
    )(x, w, b)

    if m_pad != M or n_pad != N:
        out = out[:M, :N]
    return out


# ---------------------------------------------------------------------------
# Deterministic parameter init (shapes follow PyTorch nn.Linear)
# ---------------------------------------------------------------------------
def init_params(key, in_features, out_features):
    kw, kb = jax.random.split(key)
    # torch layout: weight (out, in), bias (out,)
    w_t = jax.random.normal(kw, (out_features, in_features), jnp.float32) * 0.2
    b_t = 0.1 * jax.random.normal(kb, (out_features,), jnp.float32)
    return dict(
        # kernel layout: weight transposed so channels sit on the lane dim
        w=jnp.transpose(w_t, (1, 0)),                     # (K, N)
        b=b_t.reshape(1, out_features),                   # (1, N)
        # torch-layout copies kept only for the pure-JAX reference
        w_t=w_t, b_t=b_t,
    )


# ---------------------------------------------------------------------------
# Pure-JAX reference (mirrors Normalizer4CRD.forward exactly)
# ---------------------------------------------------------------------------
def ref_forward(params, x, power=2):
    z = x @ params["w_t"].T + params["b_t"][None, :]
    norm = jnp.power(jnp.sum(jnp.power(z, power), axis=1, keepdims=True),
                     1.0 / power)
    return z / norm


if __name__ == "__main__":
    key = jax.random.PRNGKey(0)
    k_param, k_x = jax.random.split(key)

    # Small shapes: batch=6 (exercises row padding to the 8-sublane tile),
    # in_features=32, out_features=100 (exercises lane padding to 128).
    M, K, N = 6, 32, 100
    power = 2

    params = init_params(k_param, K, N)
    x = jax.random.normal(k_x, (M, K), jnp.float32)

    out = normalizer4crd_forward(params, x, power=power)
    jax.block_until_ready(out)

    out_ref = ref_forward(params, x, power=power)
    np.testing.assert_allclose(np.asarray(out), np.asarray(out_ref),
                               rtol=1e-4, atol=1e-4)
    assert out.shape == (M, N)

    print("KERNEL_OK")
</pallas_src>

<mosaic_0001>
module attributes {stable_mosaic.version = 11 : i64} {
  func.func @_normalizer_kernel(%arg0: i32, %arg1: memref<8x32xf32, #tpu.memory_space<vmem>>, %arg2: memref<32x128xf32, #tpu.memory_space<vmem>>, %arg3: memref<1x128xf32, #tpu.memory_space<vmem>>, %arg4: memref<8x128xf32, #tpu.memory_space<vmem>>) attributes {dimension_semantics = [#tpu.dimension_semantics<parallel>], iteration_bounds = array<i64: 1>, scalar_prefetch = 0 : i64, scratch_operands = 0 : i64, tpu.core_type = #tpu.core_type<tc>, window_params = [{transform_indices = @transform_0, window_bounds = array<i64: 8, 32>}, {pipeline_mode = #tpu.pipeline_mode<synchronous>, transform_indices = @transform_1, window_bounds = array<i64: 32, 128>}, {pipeline_mode = #tpu.pipeline_mode<synchronous>, transform_indices = @transform_2, window_bounds = array<i64: 1, 128>}, {transform_indices = @transform_3, window_bounds = array<i64: 8, 128>}]} {
    %c0 = arith.constant 0 : index
    %c0_0 = arith.constant 0 : index
    %0 = vector.load %arg1[%c0, %c0_0] : memref<8x32xf32, #tpu.memory_space<vmem>>, vector<8x32xf32>
    %c0_1 = arith.constant 0 : index
    %c0_2 = arith.constant 0 : index
    %1 = vector.load %arg2[%c0_1, %c0_2] : memref<32x128xf32, #tpu.memory_space<vmem>>, vector<32x128xf32>
    %cst = arith.constant dense<0.000000e+00> : vector<8x128xf32>
    %2 = tpu.matmul %0, %1, %cst {dimension_numbers = #tpu.dot_dimension_numbers<[1], [0], [0], [1], [0, 0, 1, 1], [], []>} : vector<8x32xf32>, vector<32x128xf32>, vector<8x128xf32> -> vector<8x128xf32>
    %c0_3 = arith.constant 0 : index
    %c0_4 = arith.constant 0 : index
    %3 = vector.load %arg3[%c0_3, %c0_4] : memref<1x128xf32, #tpu.memory_space<vmem>>, vector<1x128xf32>
    %4 = vector.broadcast %3 : vector<1x128xf32> to vector<8x128xf32>
    %5 = arith.addf %2, %4 : vector<8x128xf32>
    %6 = arith.mulf %5, %5 : vector<8x128xf32>
    %cst_5 = arith.constant dense<0.000000e+00> : vector<8xf32>
    %7 = vector.multi_reduction <add>, %6, %cst_5 [1] : vector<8x128xf32> to vector<8xf32>
    %8 = vector.shape_cast %7 : vector<8xf32> to vector<8x1xf32>
    %9 = math.rsqrt %8 : vector<8x1xf32>
    %10 = vector.broadcast %9 : vector<8x1xf32> to vector<8x128xf32>
    %11 = arith.mulf %5, %10 : vector<8x128xf32>
    %c0_6 = arith.constant 0 : index
    %c0_7 = arith.constant 0 : index
    %12 = vector.load %arg4[%c0_6, %c0_7] : memref<8x128xf32, #tpu.memory_space<vmem>>, vector<8x128xf32>
    tpu.vector_store %arg4[%c0_6, %c0_7], %11 {strides = array<i32>} : memref<8x128xf32, #tpu.memory_space<vmem>>, vector<8x128xf32>,
    return
  }
  func.func @transform_0(%arg0: i32) -> (i32, i32) {
    %c0_i32 = arith.constant 0 : i32
    %c0_i32_0 = arith.constant 0 : i32
    return %arg0, %c0_i32 : i32, i32
  }
  func.func @transform_1(%arg0: i32) -> (i32, i32) {
    %c0_i32 = arith.constant 0 : i32
    %c0_i32_0 = arith.constant 0 : i32
    %c0_i32_1 = arith.constant 0 : i32
    return %c0_i32, %c0_i32_0 : i32, i32
  }
  func.func @transform_2(%arg0: i32) -> (i32, i32) {
    %c0_i32 = arith.constant 0 : i32
    %c0_i32_0 = arith.constant 0 : i32
    %c0_i32_1 = arith.constant 0 : i32
    return %c0_i32, %c0_i32_0 : i32, i32
  }
  func.func @transform_3(%arg0: i32) -> (i32, i32) {
    %c0_i32 = arith.constant 0 : i32
    %c0_i32_0 = arith.constant 0 : i32
    return %arg0, %c0_i32 : i32, i32
  }
}

</mosaic_0001>

<bundles_post_ra>
// kernel: tpu_custom_call.1
= control target key start
LH: loop header
LB: loop body
LE: loop exit
PB: predicated region body
PF: predicated region fallthrough
CT: control target
= control target key end

     0   :  { %8 = vsyncpa [#allocation3], 0  ;;  %s235_s0 = inlined_call_operand.hbm [shape: f32[8,32], index: 0, kind: input, shape index: {}]   ;;  %s236_s1 = inlined_call_operand.hbm [shape: f32[32,128], index: 1, kind: input, shape index: {}]   ;;  %s237_s2 = inlined_call_operand.vmem [shape: f32[1,128], index: 2, kind: input, shape index: {}]   ;;  %s238_s3 = inlined_call_operand.hbm [shape: f32[8,128], index: 3, kind: output, shape index: {}]  }
   0x1   :  { %9 = vsyncpa [#allocation6], 0 }
   0x2   :  { %10 = vsyncpa [#allocation4], 0  ;;  %s16_s14 = sshll.u32 %s235_s0, 4  ;;  %s198_s15 = smov [#allocation2]   ;;  %s17_s14 = int_to_ptr.hbm [resolvable:$true] %s16_s14 }
   0x3   :  { %s18_s16 = sshll.u32 %s198_s15, 4  ;;  %s26_s19 = sshll.u32 %s236_s1, 4  ;;  %s19_s16 = int_to_ptr.vmem [resolvable:$true] %s18_s16  ;;  %s27_s19 = int_to_ptr.hbm [resolvable:$true] %s26_s19 }
   0x4   :  { %21 = dma.hbm_to_vmem [thread:$0]  %s17_s14, 128, %s19_s16, [#allocation3]  }
   0x5   :  { %s199_s20 = smov [#allocation5]   ;;  %s200_s22 = smov 128  }
   0x6   :  { %s28_s21 = sshll.u32 %s199_s20, 4  ;;  %s201_s23 = smov 8   ;;  %s29_s21 = int_to_ptr.vmem [resolvable:$true] %s28_s21 }
   0x7   :  { %34 = dma.hbm_to_vmem [thread:$0]  %s27_s19, 512, %s29_s21, [#allocation6], %s200_s22, %s200_s22, %s201_s23  }
   0x8   :  { %192 = dma.done.wait [#allocation3], 128  }
   0x9   :  { %193 = vsyncadd [#allocation3], 4294967168 }
   0xa   :  { %194 = dma.done.wait [#allocation6], 512  }
   0xb   :  { %195 = vsyncadd [#allocation6], 4294966784  ;;  %v49_v0 = vld [vmem:[#allocation5 + $0x18] sm:$0xff]  ;;  %v48_v1 = vld [vmem:[#allocation5 + $0x10] sm:$0xff]  ;;  %vm54_vm0 = vcmask 261120   ;;  %s202_s24 = smov [#allocation7]  }
   0xc   :  { %70 = vmatpush.msra.mxu0 %v49_v0  ;;  %v47_v2 = vld [vmem:[#allocation5 + $0x8] sm:$0xff]  ;;  %v46_v3 = vld [vmem:[#allocation5] sm:$0xff]  ;;  %v45_v4 = vld [vmem:[#allocation2] sm:$0xff]  ;;  %s98_s25 = sshll.u32 %s202_s24, 4  ;;  %s99_s25 = int_to_ptr.vmem [resolvable:$true] %s98_s25 }
   0xd   :  { %v117_v5 = vld [vmem:[%s237_s2] ss:$0 sm:$0xff]  ;;  %s100_s2 = sshll.u32 %s238_s3, 4  ;;  %s101_s2 = int_to_ptr.hbm [resolvable:$true] %s100_s2 }
   0xe   :  { %71 = vmatpush.msra.mxu0 %v48_v1 }
  0x10   :  { %72 = vmatpush.msra.mxu0 %v47_v2 }
  0x12   :  { %73 = vmatpush.msra.mxu0 %v46_v3 }
  0x13   :  { %111 = vmatmul.msk.f32.vlgmr.msra.gmra.mxu0 %vm54_vm0, %v45_v4 }
  0x90   :  { %v75_v6 = vpop.f32.mrf.mxu0 }
  0x91   :  { %v76_v7 = vadd.f32 %v117_v5, %v75_v6 }
  0x93   :  { %v78_v8 = vmul.f32 %v76_v7, %v76_v7 }
  0x95   :  { %79 = vadd.xlane.f32.xlu0 %v78_v8 }
 0x108   :  { %v80_v9 = vpop.xlane.xlu0 %79 }
 0x109   :  { %118 = vrsqrt.f32 %v80_v9  ;;  %vm87_vm2 = vweird.f32 %v80_v9 }
 0x10f   :  { %v119_v10 = vpop.eup %118 }
 0x110   :  { %v82_v11 = vmul.f32 %v119_v10, %v80_v9  ;;  %vm88_vm1 = vweird.f32 %v119_v10 }
 0x111   :  { %vm89_vm3 = vmor %vm87_vm2, %vm88_vm1 }
 0x112   :  { %v83_v12 = vmul.f32 %v119_v10, %v82_v11 }
 0x114   :  { %v84_v13 = vmul.f32 0.5, %v83_v12 }
 0x116   :  { %v85_v14 = vsub.f32 1.5, %v84_v13 }
 0x118   :  { %v86_v15 = vmul.f32 %v119_v10, %v85_v14 }
 0x11a   :  { %v90_v16 = vsel %vm89_vm3, %v119_v10, %v86_v15 }
 0x11b   :  { %v91_v17 = vmul.f32 %v90_v16, %v76_v7 }
 0x11d   :  { %92 = vst [vmem:[#allocation7] sm:$0xff] %v91_v17 }
 0x11e   :  { %103 = dma.vmem_to_hbm [thread:$0]  %s99_s25, 128, %s101_s2, [#allocation4]  }
 0x11f   :  { %196 = dma.done.wait [#allocation4], 128  }
 0x120   :  { %197 = vsyncadd [#allocation4], 4294967168 }
 0x121   :  { %108 = vsyncpa [#allocation3], 1 }
 0x122   :  { %109 = vsyncpa [#allocation6], 1 }
 0x123   :  { %110 = vsyncpa [#allocation4], 1 }

</bundles_post_ra>
